<compile_context>
chip_gen: v5e
topology: v5e:2x2
jax: 0.10.0
libtpu: 0.0.40
codegen_flags: <defaults>
</compile_context>

<pallas_src>
import functools
import math

import jax
import jax.numpy as jnp
from jax.experimental import pallas as pl
from jax.experimental.pallas import tpu as pltpu

_MIB = 1024 * 1024


def _gelu_tanh(x):
    # PyTorch nn.GELU(approximate='tanh'):
    # 0.5 * x * (1 + tanh(sqrt(2/pi) * (x + 0.044715 * x^3)))
    c = math.sqrt(2.0 / math.pi)
    return 0.5 * x * (1.0 + jnp.tanh(c * (x + 0.044715 * x * x * x)))


# ----------------------------------------------------------------------------
# Kernels
# ----------------------------------------------------------------------------

def _mlp_kernel_resident(x_ref, wfc_ref, bfc_ref, wproj_ref, bproj_ref, o_ref,
                         *, gelu_dtype):
    # x_ref: (tm, C)   wfc_ref: (C, H)  bfc_ref: (1, H)
    # wproj_ref: (H, C)  bproj_ref: (1, C)  o_ref: (tm, C)
    # Weights have constant block indices -> DMA'd once, resident across row tiles.
    h = jnp.dot(x_ref[...], wfc_ref[...], preferred_element_type=jnp.float32)
    h = h + bfc_ref[...].astype(jnp.float32)
    h = _gelu_tanh(h.astype(gelu_dtype))          # bf16 GELU on v6e/v7x, f32 otherwise
    y = jnp.dot(h.astype(wproj_ref.dtype), wproj_ref[...],
                preferred_element_type=jnp.float32)
    y = y + bproj_ref[...].astype(jnp.float32)
    # TODO(synk): dropout is identity in eval mode / p=0; a training-mode mask
    # would use pltpu.prng_seed + pltpu.prng_random_bits here.
    o_ref[...] = y.astype(o_ref.dtype)


def _mlp_kernel_chunked(x_ref, wfc_ref, bfc_ref, wproj_ref, bproj_ref, o_ref,
                        acc_ref, *, gelu_dtype):
    # x_ref:    (tm, C)        wfc_ref:   (C, th)    bfc_ref:   (1, th)
    # wproj_ref:(th, C)        bproj_ref: (1, C)
    # o_ref:    (tm, C)        acc_ref:   (tm, C) f32 scratch across the H axis
    h_idx = pl.program_id(1)

    @pl.when(h_idx == 0)
    def _():
        acc_ref[...] = jnp.zeros_like(acc_ref)

    # c_fc chunk: (tm, C) @ (C, th) on the MXU, f32 accumulation.
    h = jnp.dot(x_ref[...], wfc_ref[...], preferred_element_type=jnp.float32)
    h = h + bfc_ref[...].astype(jnp.float32)
    h = _gelu_tanh(h.astype(gelu_dtype))

    # Partial c_proj: (tm, th) @ (th, C), accumulated into the f32 scratch.
    acc_ref[...] += jnp.dot(h.astype(wproj_ref.dtype), wproj_ref[...],
                            preferred_element_type=jnp.float32)

    @pl.when(h_idx == pl.num_programs(1) - 1)
    def _():
        y = acc_ref[...] + bproj_ref[...].astype(jnp.float32)
        # TODO(synk): dropout is identity in eval mode / p=0.
        o_ref[...] = y.astype(o_ref.dtype)


# ----------------------------------------------------------------------------
# Heuristics
# ----------------------------------------------------------------------------

def _round_up(x, m):
    return ((x + m - 1) // m) * m


def _device_kind():
    try:
        return jax.devices()[0].device_kind.lower()
    except Exception:
        return ""


def _vmem_capacity_bytes():
    try:
        cap = int(pltpu.get_tpu_info().vmem_capacity_bytes)
        if 16 * _MIB <= cap <= 256 * _MIB:
            return cap
    except Exception:
        pass
    if "v7" in _device_kind():
        return 64 * _MIB
    return 128 * _MIB


def _gelu_compute_dtype(weight_dtype):
    # bf16 GELU only where the VPU/EUP have bf16 paths (v6e/v7x); f32 on v5.
    if jnp.dtype(weight_dtype) == jnp.bfloat16 and "v5" not in _device_kind():
        return jnp.bfloat16
    return jnp.float32


def _pick_row_tile(M, target=1024):
    """Row tile: multiple of 8, large (amortizes weight streaming), clamped to M."""
    tm = max(8, min(target, _round_up(M, 8)))
    # Keep >= 2 row tiles where reasonable so the "parallel" row axis can shard
    # across both v7x TensorCores.
    if _round_up(M, tm) // tm < 2 and tm >= 512:
        tm = _round_up(tm // 2, 8)
    return tm


def _pick_h_chunk(H, target=1024):
    """Largest 256-aligned (preferred) divisor of H <= target; fall back to 128."""
    for step in (256, 128):
        if H % step != 0:
            continue
        best = step
        for th in range(step, min(target, H) + 1, step):
            if H % th == 0:
                best = th
        return best
    return H


# ----------------------------------------------------------------------------
# Wrapper
# ----------------------------------------------------------------------------

def mlp_forward(x, w_fc, b_fc, w_proj, b_proj, *, tm=None, th=None, resident=None):
    """x: (B, T, C).  w_fc: (C, 4C), b_fc: (4C,), w_proj: (4C, C), b_proj: (C,).

    Weights are stored pre-transposed as (in, out) so the kernel computes
    row_tile @ W (MXU-friendly).  Works for any (B, T); rows are zero-padded
    up to a multiple of the row tile and the padding is sliced off.
    """
    B, T, C = x.shape
    H = w_fc.shape[1]
    M = B * T

    xb = jnp.dtype(x.dtype).itemsize
    wb = jnp.dtype(w_fc.dtype).itemsize
    gelu_dtype = _gelu_compute_dtype(w_proj.dtype)
    hb = jnp.dtype(gelu_dtype).itemsize

    vmem_cap = _vmem_capacity_bytes()

    if tm is None:
        tm = _pick_row_tile(M)
    if th is None:
        th = _pick_h_chunk(H)
    assert tm % 8 == 0
    assert H % th == 0

    def resident_est(tm_):
        return (4 * tm_ * C * xb                    # x + out tiles (double-buffered)
                + 2 * (C * H + H) * wb              # W_fc + b_fc
                + 2 * (H * C + C) * wb              # W_proj + b_proj
                + tm_ * H * 4 + tm_ * H * hb        # f32 hidden + gelu-dtype copy
                + tm_ * C * 4)                      # headroom

    def chunked_est(tm_, th_):
        return (4 * tm_ * C * xb                    # x + out tiles
                + 2 * (C * th_ + th_) * wb          # W_fc / b_fc chunks
                + 2 * (th_ * C + C) * wb            # W_proj chunk + b_proj
                + tm_ * C * 4                       # f32 accumulator scratch
                + tm_ * th_ * 4 + tm_ * th_ * hb)   # hidden chunk + gelu-dtype copy

    if resident is None:
        resident = resident_est(tm) <= int(0.70 * vmem_cap)

    budget = int(0.80 * vmem_cap)
    if not resident:
        # Shrink the row tile if the chunked working set would blow the budget
        # (matters on v7x's 64 MiB for very large C).
        while chunked_est(tm, th) > budget and tm > 256:
            tm = max(256, _round_up(tm // 2, 8))

    Mp = _round_up(M, tm)
    n_row_tiles = Mp // tm

    x2 = x.reshape(M, C)
    if Mp != M:
        x2 = jnp.pad(x2, ((0, Mp - M), (0, 0)))
    b_fc2 = b_fc.reshape(1, H)
    b_proj2 = b_proj.reshape(1, C)

    # Accurate(ish) advisory cost: weights are read once (resident) or once per
    # row tile (chunked); activations use padded Mp.
    weight_bytes = (C * H + H + H * C + C) * wb
    weight_traffic = weight_bytes * (1 if resident else n_row_tiles)
    cost = pl.CostEstimate(
        flops=4 * Mp * C * H,                 # two matmuls: 2*Mp*C*H each
        transcendentals=Mp * H,               # tanh in GELU
        bytes_accessed=Mp * C * xb + weight_traffic + Mp * C * xb,
    )

    est = resident_est(tm) if resident else chunked_est(tm, th)
    vmem_limit = int(min(max(2 * est, 32 * _MIB), int(0.85 * vmem_cap)))

    if resident:
        kernel = functools.partial(_mlp_kernel_resident, gelu_dtype=gelu_dtype)
        grid_spec = pltpu.PrefetchScalarGridSpec(
            num_scalar_prefetch=0,
            grid=(n_row_tiles,),
            in_specs=[
                pl.BlockSpec((tm, C), lambda i: (i, 0)),   # x row tile
                pl.BlockSpec((C, H), lambda i: (0, 0)),    # W_fc (resident)
                pl.BlockSpec((1, H), lambda i: (0, 0)),    # b_fc (resident)
                pl.BlockSpec((H, C), lambda i: (0, 0)),    # W_proj (resident)
                pl.BlockSpec((1, C), lambda i: (0, 0)),    # b_proj (resident)
            ],
            out_specs=pl.BlockSpec((tm, C), lambda i: (i, 0)),
        )
        dim_sem = ("parallel",)
    else:
        kernel = functools.partial(_mlp_kernel_chunked, gelu_dtype=gelu_dtype)
        grid_spec = pltpu.PrefetchScalarGridSpec(
            num_scalar_prefetch=0,
            grid=(n_row_tiles, H // th),         # rows parallel, H reduction last
            in_specs=[
                pl.BlockSpec((tm, C), lambda i, h: (i, 0)),   # x row tile
                pl.BlockSpec((C, th), lambda i, h: (0, h)),   # W_fc H-chunk
                pl.BlockSpec((1, th), lambda i, h: (0, h)),   # b_fc H-chunk
                pl.BlockSpec((th, C), lambda i, h: (h, 0)),   # W_proj H-chunk
                pl.BlockSpec((1, C), lambda i, h: (0, 0)),    # b_proj
            ],
            out_specs=pl.BlockSpec((tm, C), lambda i, h: (i, 0)),
            scratch_shapes=[pltpu.VMEM((tm, C), jnp.float32)],
        )
        dim_sem = ("parallel", "arbitrary")

    out2 = pl.pallas_call(
        kernel,
        out_shape=jax.ShapeDtypeStruct((Mp, C), x.dtype),
        grid_spec=grid_spec,
        compiler_params=pltpu.CompilerParams(
            dimension_semantics=dim_sem,
            vmem_limit_bytes=vmem_limit,
        ),
        cost_estimate=cost,
    )(x2, w_fc, b_fc2, w_proj, b_proj2)

    if Mp != M:
        out2 = out2[:M]
    return out2.reshape(B, T, C)


def reference_mlp(x, w_fc, b_fc, w_proj, b_proj):
    x32 = x.astype(jnp.float32)
    h = jnp.einsum("btc,ch->bth", x32, w_fc.astype(jnp.float32)) + b_fc.astype(jnp.float32)
    h = _gelu_tanh(h)
    return jnp.einsum("bth,hc->btc", h, w_proj.astype(jnp.float32)) + b_proj.astype(jnp.float32)


if __name__ == "__main__":
    def make_inputs(key, B, T, C, dtype):
        H = 4 * C
        kx, kwf, kbf, kwp, kbp = jax.random.split(key, 5)
        x = jax.random.normal(kx, (B, T, C), dtype=jnp.float32)
        # nn.Linear(n_embd, 4*n_embd): weight (4C, C); stored transposed (C, 4C).
        w_fc = jax.random.normal(kwf, (C, H), dtype=jnp.float32) * 0.02
        b_fc = jax.random.normal(kbf, (H,), dtype=jnp.float32) * 0.02
        # nn.Linear(4*n_embd, n_embd): weight (C, 4C); stored transposed (4C, C).
        w_proj = jax.random.normal(kwp, (H, C), dtype=jnp.float32) * 0.02
        b_proj = jax.random.normal(kbp, (C,), dtype=jnp.float32) * 0.02
        return tuple(a.astype(dtype) for a in (x, w_fc, b_fc, w_proj, b_proj))

    key0 = jax.random.PRNGKey(0)

    # --- Config A: tiny GPT-2-like (n_embd=32, hidden=128), f32, resident path ---
    xA, wfA, bfA, wpA, bpA = make_inputs(key0, 2, 8, 32, jnp.float32)
    outA = jax.block_until_ready(mlp_forward(xA, wfA, bfA, wpA, bpA))
    refA = reference_mlp(xA, wfA, bfA, wpA, bpA)
    assert outA.shape == xA.shape
    assert jnp.allclose(outA, refA, atol=1e-5, rtol=1e-5), "f32 resident mismatch"

    # --- padded row count (M not divisible by the row tile) ---
    x_odd = xA[:, :5, :]
    out_odd = jax.block_until_ready(mlp_forward(x_odd, wfA, bfA, wpA, bpA))
    ref_odd = reference_mlp(x_odd, wfA, bfA, wpA, bpA)
    assert jnp.allclose(out_odd, ref_odd, atol=1e-5, rtol=1e-5), "padded-row mismatch"

    # --- Config A in bf16 (bf16 GELU on v6e/v7x, f32 GELU on v5) ---
    xAb, wfAb, bfAb, wpAb, bpAb = make_inputs(key0, 2, 8, 32, jnp.bfloat16)
    outAb = jax.block_until_ready(mlp_forward(xAb, wfAb, bfAb, wpAb, bpAb))
    refAb = reference_mlp(xAb, wfAb, bfAb, wpAb, bpAb)
    assert jnp.allclose(outAb.astype(jnp.float32), refAb, atol=2e-2, rtol=5e-2), \
        "bf16 resident mismatch"

    # --- Config B: n_embd=128, hidden=512; force the H-chunked reduction path ---
    key1 = jax.random.PRNGKey(1)
    xB, wfB, bfB, wpB, bpB = make_inputs(key1, 2, 8, 128, jnp.float32)
    outB = jax.block_until_ready(
        mlp_forward(xB, wfB, bfB, wpB, bpB, th=128, resident=False))
    refB = reference_mlp(xB, wfB, bfB, wpB, bpB)
    assert jnp.allclose(outB, refB, atol=1e-4, rtol=1e-4), "f32 chunked mismatch"

    xBb, wfBb, bfBb, wpBb, bpBb = make_inputs(key1, 2, 8, 128, jnp.bfloat16)
    outBb = jax.block_until_ready(
        mlp_forward(xBb, wfBb, bfBb, wpBb, bpBb, th=128, resident=False))
    refBb = reference_mlp(xBb, wfBb, bfBb, wpBb, bpBb)
    assert jnp.allclose(outBb.astype(jnp.float32), refBb, atol=2e-2, rtol=5e-2), \
        "bf16 chunked mismatch"

    print("KERNEL_OK")
</pallas_src>

<mosaic_0001>
module attributes {stable_mosaic.version = 11 : i64} {
  func.func @_mlp_kernel_resident(%arg0: i32, %arg1: memref<16x32xf32, #tpu.memory_space<vmem>>, %arg2: memref<32x128xf32, #tpu.memory_space<vmem>>, %arg3: memref<1x128xf32, #tpu.memory_space<vmem>>, %arg4: memref<128x32xf32, #tpu.memory_space<vmem>>, %arg5: memref<1x32xf32, #tpu.memory_space<vmem>>, %arg6: memref<16x32xf32, #tpu.memory_space<vmem>>) attributes {dimension_semantics = [#tpu.dimension_semantics<parallel>], iteration_bounds = array<i64: 1>, scalar_prefetch = 0 : i64, scratch_operands = 0 : i64, tpu.core_type = #tpu.core_type<tc>, window_params = [{transform_indices = @transform_0, window_bounds = array<i64: 16, 32>}, {pipeline_mode = #tpu.pipeline_mode<synchronous>, transform_indices = @transform_1, window_bounds = array<i64: 32, 128>}, {pipeline_mode = #tpu.pipeline_mode<synchronous>, transform_indices = @transform_2, window_bounds = array<i64: 1, 128>}, {pipeline_mode = #tpu.pipeline_mode<synchronous>, transform_indices = @transform_3, window_bounds = array<i64: 128, 32>}, {pipeline_mode = #tpu.pipeline_mode<synchronous>, transform_indices = @transform_4, window_bounds = array<i64: 1, 32>}, {transform_indices = @transform_5, window_bounds = array<i64: 16, 32>}]} {
    %c0 = arith.constant 0 : index
    %c0_0 = arith.constant 0 : index
    %0 = vector.load %arg1[%c0, %c0_0] : memref<16x32xf32, #tpu.memory_space<vmem>>, vector<16x32xf32>
    %c0_1 = arith.constant 0 : index
    %c0_2 = arith.constant 0 : index
    %1 = vector.load %arg2[%c0_1, %c0_2] : memref<32x128xf32, #tpu.memory_space<vmem>>, vector<32x128xf32>
    %cst = arith.constant dense<0.000000e+00> : vector<16x128xf32>
    %2 = tpu.matmul %0, %1, %cst {dimension_numbers = #tpu.dot_dimension_numbers<[1], [0], [0], [1], [0, 0, 1, 1], [], []>} : vector<16x32xf32>, vector<32x128xf32>, vector<16x128xf32> -> vector<16x128xf32>
    %c0_3 = arith.constant 0 : index
    %c0_4 = arith.constant 0 : index
    %3 = vector.load %arg3[%c0_3, %c0_4] : memref<1x128xf32, #tpu.memory_space<vmem>>, vector<1x128xf32>
    %4 = vector.broadcast %3 : vector<1x128xf32> to vector<16x128xf32>
    %5 = arith.addf %2, %4 : vector<16x128xf32>
    %cst_5 = arith.constant 5.000000e-01 : f32
    %6 = vector.broadcast %cst_5 : f32 to vector<16x128xf32>
    %7 = arith.mulf %6, %5 : vector<16x128xf32>
    %cst_6 = arith.constant 4.471500e-02 : f32
    %8 = vector.broadcast %cst_6 : f32 to vector<16x128xf32>
    %9 = arith.mulf %8, %5 : vector<16x128xf32>
    %10 = arith.mulf %9, %5 : vector<16x128xf32>
    %11 = arith.mulf %10, %5 : vector<16x128xf32>
    %12 = arith.addf %5, %11 : vector<16x128xf32>
    %cst_7 = arith.constant 0.797884583 : f32
    %13 = vector.broadcast %cst_7 : f32 to vector<16x128xf32>
    %14 = arith.mulf %13, %12 : vector<16x128xf32>
    %15 = math.tanh %14 : vector<16x128xf32>
    %cst_8 = arith.constant 1.000000e+00 : f32
    %16 = vector.broadcast %cst_8 : f32 to vector<16x128xf32>
    %17 = arith.addf %16, %15 : vector<16x128xf32>
    %18 = arith.mulf %7, %17 : vector<16x128xf32>
    %c0_9 = arith.constant 0 : index
    %c0_10 = arith.constant 0 : index
    %19 = vector.load %arg4[%c0_9, %c0_10] : memref<128x32xf32, #tpu.memory_space<vmem>>, vector<128x32xf32>
    %cst_11 = arith.constant dense<0.000000e+00> : vector<16x32xf32>
    %20 = tpu.matmul %18, %19, %cst_11 {dimension_numbers = #tpu.dot_dimension_numbers<[1], [0], [0], [1], [0, 0, 1, 1], [], []>} : vector<16x128xf32>, vector<128x32xf32>, vector<16x32xf32> -> vector<16x32xf32>
    %c0_12 = arith.constant 0 : index
    %c0_13 = arith.constant 0 : index
    %21 = vector.load %arg5[%c0_12, %c0_13] : memref<1x32xf32, #tpu.memory_space<vmem>>, vector<1x32xf32>
    %22 = vector.broadcast %21 : vector<1x32xf32> to vector<16x32xf32>
    %23 = arith.addf %20, %22 : vector<16x32xf32>
    %c0_14 = arith.constant 0 : index
    %c0_15 = arith.constant 0 : index
    %24 = vector.load %arg6[%c0_14, %c0_15] : memref<16x32xf32, #tpu.memory_space<vmem>>, vector<16x32xf32>
    tpu.vector_store %arg6[%c0_14, %c0_15], %23 {strides = array<i32>} : memref<16x32xf32, #tpu.memory_space<vmem>>, vector<16x32xf32>,
    return
  }
  func.func @transform_0(%arg0: i32) -> (i32, i32) {
    %c0_i32 = arith.constant 0 : i32
    %c0_i32_0 = arith.constant 0 : i32
    return %arg0, %c0_i32 : i32, i32
  }
  func.func @transform_1(%arg0: i32) -> (i32, i32) {
    %c0_i32 = arith.constant 0 : i32
    %c0_i32_0 = arith.constant 0 : i32
    %c0_i32_1 = arith.constant 0 : i32
    return %c0_i32, %c0_i32_0 : i32, i32
  }
  func.func @transform_2(%arg0: i32) -> (i32, i32) {
    %c0_i32 = arith.constant 0 : i32
    %c0_i32_0 = arith.constant 0 : i32
    %c0_i32_1 = arith.constant 0 : i32
    return %c0_i32, %c0_i32_0 : i32, i32
  }
  func.func @transform_3(%arg0: i32) -> (i32, i32) {
    %c0_i32 = arith.constant 0 : i32
    %c0_i32_0 = arith.constant 0 : i32
    %c0_i32_1 = arith.constant 0 : i32
    return %c0_i32, %c0_i32_0 : i32, i32
  }
  func.func @transform_4(%arg0: i32) -> (i32, i32) {
    %c0_i32 = arith.constant 0 : i32
    %c0_i32_0 = arith.constant 0 : i32
    %c0_i32_1 = arith.constant 0 : i32
    return %c0_i32, %c0_i32_0 : i32, i32
  }
  func.func @transform_5(%arg0: i32) -> (i32, i32) {
    %c0_i32 = arith.constant 0 : i32
    %c0_i32_0 = arith.constant 0 : i32
    return %arg0, %c0_i32 : i32, i32
  }
}

</mosaic_0001>

<bundles_post_ra>
// kernel: tpu_custom_call.1
= control target key start
LH: loop header
LB: loop body
LE: loop exit
PB: predicated region body
PF: predicated region fallthrough
CT: control target
= control target key end

     0   :  { %s307_s0 = inlined_call_operand.vmem [shape: f32[16,32], index: 0, kind: input, shape index: {}]   ;;  %s308_s1 = inlined_call_operand.vmem [shape: f32[32,128], index: 1, kind: input, shape index: {}]   ;;  %s309_s2 = inlined_call_operand.vmem [shape: f32[1,128], index: 2, kind: input, shape index: {}]   ;;  %s310_s3 = inlined_call_operand.vmem [shape: f32[128,32], index: 3, kind: input, shape index: {}]   ;;  %s311_s4 = inlined_call_operand.vmem [shape: f32[1,32], index: 4, kind: input, shape index: {}]   ;;  %s312_s5 = inlined_call_operand.hbm [shape: f32[16,32], index: 5, kind: output, shape index: {}]  }
   0x1   :  { %v26_v0 = vld [vmem:[%s308_s1 + $0x18] sm:$0xff]  ;;  %v25_v1 = vld [vmem:[%s308_s1 + $0x10] sm:$0xff]  ;;  %v24_v2 = vld [vmem:[%s308_s1 + $0x8] sm:$0xff] }
   0x2   :  { %50 = vmatpush.msra.mxu0 %v26_v0  ;;  %v94_v3 = vld [vmem:[%s310_s3 + $0x78] sm:$0xff]  ;;  %v93_v4 = vld [vmem:[%s310_s3 + $0x70] sm:$0xff]  ;;  %v23_v5 = vld [vmem:[%s308_s1] sm:$0xff] }
   0x3   :  { %99 = vmatpush.msra.mxu1 %v94_v3  ;;  %v92_v6 = vld [vmem:[%s310_s3 + $0x68] sm:$0xff]  ;;  %144 = vmatpush.msra.mxu2 %v94_v3 }
   0x4   :  { %51 = vmatpush.msra.mxu0 %v25_v1 }
   0x5   :  { %10 = vsyncpa [#allocation3], 0  ;;  %v21_v7 = vld [vmem:[%s307_s0] sm:$0xff]  ;;  %vm31_vm0 = vcmask 261120   ;;  %100 = vmatpush.msra.mxu1 %v93_v4  ;;  %145 = vmatpush.msra.mxu2 %v93_v4  ;;  %v22_v9 = vld [vmem:[%s307_s0 + $0x8] sm:$0xff]  ;;  %s195_s11 = smov [#allocation2]  }
   0x6   :  { %52 = vmatpush.msra.mxu0 %v24_v2  ;;  %v91_v8 = vld [vmem:[%s310_s3 + $0x60] sm:$0xff]  ;;  %v90_v10 = vld [vmem:[%s310_s3 + $0x58] sm:$0xff]  ;;  %v89_v11 = vld [vmem:[%s310_s3 + $0x50] sm:$0xff]  ;;  %s128_s12 = sshll.u32 %s195_s11, 4  ;;  %s130_s15 = sshll.u32 %s312_s5, 4  ;;  %s129_s12 = int_to_ptr.vmem [resolvable:$true] %s128_s12  ;;  %s131_s15 = int_to_ptr.hbm [resolvable:$true] %s130_s15 }
   0x7   :  { %101 = vmatpush.msra.mxu1 %v92_v6  ;;  %146 = vmatpush.msra.mxu2 %v92_v6  ;;  %v88_v12 = vld [vmem:[%s310_s3 + $0x48] sm:$0xff]  ;;  %v87_v13 = vld [vmem:[%s310_s3 + $0x40] sm:$0xff]  ;;  %v86_v14 = vld [vmem:[%s310_s3 + $0x38] sm:$0xff]  ;;  %s196_s16 = smov 128   ;;  %s197_s17 = smov 8  }
   0x8   :  { %53 = vmatpush.msra.mxu0 %v23_v5  ;;  %v85_v15 = vld [vmem:[%s310_s3 + $0x30] sm:$0xff]  ;;  %v84_v16 = vld [vmem:[%s310_s3 + $0x28] sm:$0xff]  ;;  %v83_v17 = vld [vmem:[%s310_s3 + $0x20] sm:$0xff] }
   0x9   :  { %142 = vmatmul.msk.f32.vlgmr.msra.gmra.mxu0 %vm31_vm0, %v21_v7  ;;  %102 = vmatpush.msra.mxu1 %v91_v8  ;;  %v82_v18 = vld [vmem:[%s310_s3 + $0x18] sm:$0xff]  ;;  %v81_v19 = vld [vmem:[%s310_s3 + $0x10] sm:$0xff]  ;;  %v80_v20 = vld [vmem:[%s310_s3 + $0x8] sm:$0xff] }
   0xa   :  { %147 = vmatpush.msra.mxu2 %v91_v8  ;;  %v79_v21 = vld [vmem:[%s310_s3] sm:$0xff] }
   0xb   :  { %103 = vmatpush.msra.mxu1 %v90_v10  ;;  %v163_v22 = vld [vmem:[%s309_s2] ss:$0 sm:$0xff] }
   0xc   :  { %148 = vmatpush.msra.mxu2 %v90_v10  ;;  %v164_v45 = vld [vmem:[%s311_s4] ss:$0 sm:$0xff] }
   0xd   :  { %104 = vmatpush.msra.mxu1 %v89_v11 }
   0xe   :  { %149 = vmatpush.msra.mxu2 %v89_v11 }
   0xf   :  { %105 = vmatpush.msra.mxu1 %v88_v12 }
  0x10   :  { %150 = vmatpush.msra.mxu2 %v88_v12 }
  0x11   :  { %143 = vmatmul.msk.f32.gmra.mxu0 %vm31_vm0, %v22_v9  ;;  %106 = vmatpush.msra.mxu1 %v87_v13 }
  0x12   :  { %151 = vmatpush.msra.mxu2 %v87_v13 }
  0x13   :  { %107 = vmatpush.msra.mxu1 %v86_v14 }
  0x14   :  { %152 = vmatpush.msra.mxu2 %v86_v14 }
  0x15   :  { %108 = vmatpush.msra.mxu1 %v85_v15 }
  0x16   :  { %153 = vmatpush.msra.mxu2 %v85_v15 }
  0x17   :  { %109 = vmatpush.msra.mxu1 %v84_v16 }
  0x18   :  { %154 = vmatpush.msra.mxu2 %v84_v16 }
  0x19   :  { %110 = vmatpush.msra.mxu1 %v83_v17 }
  0x1a   :  { %155 = vmatpush.msra.mxu2 %v83_v17 }
  0x1b   :  { %111 = vmatpush.msra.mxu1 %v82_v18 }
  0x1c   :  { %156 = vmatpush.msra.mxu2 %v82_v18 }
  0x1d   :  { %112 = vmatpush.msra.mxu1 %v81_v19 }
  0x1e   :  { %157 = vmatpush.msra.mxu2 %v81_v19 }
  0x1f   :  { %113 = vmatpush.msra.mxu1 %v80_v20 }
  0x20   :  { %158 = vmatpush.msra.mxu2 %v80_v20 }
  0x21   :  { %114 = vmatpush.msra.mxu1 %v79_v21 }
  0x22   :  { %159 = vmatpush.msra.mxu2 %v79_v21 }
  0x86   :  { %v55_v23 = vpop.f32.mrf.mxu0 }
  0x87   :  { %v56_v24 = vadd.f32 %v163_v22, %v55_v23 }
  0x89   :  { %v63_v25 = vmul.f32 0.044715, %v56_v24  ;;  %v61_v38 = vmul.f32 0.5, %v56_v24 }
  0x8b   :  { %v65_v26 = vmul.f32 %v63_v25, %v56_v24 }
  0x8d   :  { %v67_v27 = vmul.f32 %v65_v26, %v56_v24 }
  0x8e   :  { %v58_v28 = vpop.f32.mrf.mxu0 }
  0x8f   :  { %v59_v29 = vadd.f32 %v163_v22, %v58_v28  ;;  %v69_v30 = vadd.f32 %v67_v27, %v56_v24 }
  0x91   :  { %v71_v31 = vmul.f32 0.7978846, %v69_v30  ;;  %v64_v32 = vmul.f32 0.044715, %v59_v29  ;;  %v62_v42 = vmul.f32 0.5, %v59_v29 }
  0x93   :  { %165 = vtanh.f32 %v71_v31  ;;  %v66_v33 = vmul.f32 %v64_v32, %v59_v29 }
  0x95   :  { %v68_v34 = vmul.f32 %v66_v33, %v59_v29 }
  0x97   :  { %v70_v35 = vadd.f32 %v68_v34, %v59_v29 }
  0x99   :  { %v166_v36 = vpop.eup %165  ;;  %v72_v37 = vmul.f32 0.7978846, %v70_v35 }
  0x9a   :  { %v75_v39 = vadd.f32 1.0, %v166_v36 }
  0x9b   :  { %167 = vtanh.f32 %v72_v37 }
  0x9c   :  { %v77_v40 = vmul.f32 %v75_v39, %v61_v38 }
  0x9e   :  { %115 = vmatmul.f32.vlgmr.msra.gmra.mxu1 %v77_v40 }
  0xa1   :  { %v168_v41 = vpop.eup %167 }
  0xa2   :  { %v76_v43 = vadd.f32 1.0, %v168_v41 }
  0xa4   :  { %v78_v44 = vmul.f32 %v76_v43, %v62_v42 }
  0xa6   :  { %118 = vmatmul.f32.vlgmr.msra.gmra.mxu2 %v78_v44 }
 0x11b   :  { %v116_v46 = vpop.f32.mrf.mxu1 }
 0x11c   :  { %v117_v47 = vadd.f32 %v164_v45, %v116_v46 }
 0x11e   :  { %122 = vst.msk [vmem:[#allocation2] sm:$0xff] %vm31_vm0, %v117_v47 }
 0x129   :  { %v119_v48 = vpop.f32.mrf.mxu2 }
 0x12a   :  { %v120_v49 = vadd.f32 %v164_v45, %v119_v48 }
 0x12c   :  { %123 = vst.msk [vmem:[#allocation2 + $0x8] sm:$0xff] %vm31_vm0, %v120_v49 }
 0x12d   :  { %136 = dma.vmem_to_hbm [thread:$0]  %s129_s12, 256, %s131_s15, [#allocation3], %s196_s16, %s196_s16, %s197_s17  }
 0x12e   :  { %193 = dma.done.wait [#allocation3], 256  }
 0x12f   :  { %194 = vsyncadd [#allocation3], 4294967040 }
 0x130   :  { %141 = vsyncpa [#allocation3], 1 }

</bundles_post_ra>
